<compile_context>
chip_gen: v5e
topology: v5e:2x2
jax: 0.10.0
libtpu: 0.0.40
codegen_flags: <defaults>
</compile_context>

<pallas_src>
import numpy as np
import jax
import jax.numpy as jnp
from jax import lax
from jax.experimental import pallas as pl
from jax.experimental.pallas import tpu as pltpu


def joint_attention_kernel(
    xq_ref, gate_ref, fb_ref, fct_ref, fd_ref, alpha_ref,
    o_ref,
    m_scr, l_scr, acc_scr,
):
    ki = pl.program_id(2)
    nn = (((1,), (0,)), ((), ()))  # plain (M,K) x (K,N) contraction

    # ---- init per query tile: reset online-softmax state ----
    @pl.when(ki == 0)
    def _init():
        m_scr[...] = jnp.full_like(m_scr, -jnp.inf)
        l_scr[...] = jnp.zeros_like(l_scr)
        acc_scr[...] = jnp.zeros_like(acc_scr)

    # energy[k, q] = <fc[:, k], fb[:, q]>  (bf16 operands, f32 accumulation;
    # fcT is pre-transposed so this is a native NN matmul).
    s = lax.dot_general(fct_ref[0], fb_ref[0], nn,
                        preferred_element_type=jnp.float32)           # (TK, TQ)

    # ---- online softmax over the key axis (axis 0 of s) ----
    m_prev = m_scr[...]                                                # (1, TQ)
    m_new = jnp.maximum(m_prev, jnp.max(s, axis=0, keepdims=True))
    corr = jnp.exp(m_prev - m_new)                                     # (1, TQ)
    p = jnp.exp(s - m_new)                                             # (TK, TQ)
    l_scr[...] = corr * l_scr[...] + jnp.sum(p, axis=0, keepdims=True)
    acc_scr[...] = corr * acc_scr[...] + lax.dot_general(
        fd_ref[0], p.astype(jnp.bfloat16), nn,
        preferred_element_type=jnp.float32)                            # (C, TQ)
    m_scr[...] = m_new

    # ---- finalize: normalize, fuse residual + channel-attention gate ----
    @pl.when(ki == pl.num_programs(2) - 1)
    def _done():
        inv_l = pl.reciprocal(l_scr[...], approx=True)                 # (1, TQ)
        alpha = alpha_ref[0, 0]
        o_ref[0] = (xq_ref[0] * gate_ref[0]
                    + alpha * (acc_scr[...] * inv_l)).astype(o_ref.dtype)


def _pick_tile(hw, candidates):
    for t in candidates:
        if hw % t == 0:
            return t
    return hw


def _default_tiles(B, HW):
    # Large query tiles raise the arithmetic intensity of the kv stream
    # (FLOP/byte scales ~linearly with TQ); keep tk moderate.
    tq = _pick_tile(HW, (1024, 512, 256, 128))
    # v7x megacore: make sure the 'parallel' grid axes give both TCs work.
    while (B * (HW // tq) < 2 and tq % 2 == 0 and (tq // 2) >= 128
           and HW % (tq // 2) == 0):
        tq //= 2
    tk = _pick_tile(HW, (512, 256, 128))
    return tq, tk


def _vmem_limit_bytes():
    """3/4 of physical VMEM, capped at 100 MiB (~96 MiB on v5e/v6e, ~48 MiB on v7x)."""
    cap = 128 * 1024 * 1024
    try:
        cap = pltpu.get_tpu_info().vmem_capacity_bytes
    except Exception:
        pass
    return int(min(cap * 3 // 4, 100 * 1024 * 1024))


def joint_attention(x_nchw, params, *, tq=None, tk=None):
    (w1, s1, t1, w2, s2, t2, w3, s3, t3, w4, s4, t4,
     wb, bb, wc, bc, wd, bd, alpha) = params
    B, C, H, W = x_nchw.shape
    HW = H * W
    x = x_nchw.reshape(B, C, HW)   # channels-first; no activation transposes

    # --- Channel-attention gate (tiny M=1 matmuls; left to XLA).
    #     gate = 1 + relu_stack(maxpool(x)), matching CA(x) + PA(x) fusion.
    # TODO(synk): the max-pool is a separate HBM read of x; it could be fused
    # into a projection-precompute Pallas preamble if that read ever matters.
    pooled = jnp.max(x, axis=2)                               # (B, C)
    h = jnp.maximum(pooled @ w1 * s1 + t1, 0.0)
    h = jnp.maximum(h @ w2 * s2 + t2, 0.0)
    h = jnp.maximum(h @ w3 * s3 + t3, 0.0)
    attn_c = jnp.maximum(h @ w4 * s4 + t4, 0.0)               # (B, C)
    gate = (1.0 + attn_c)[:, :, None]                         # (B, C, 1)

    # --- Hoisted 1x1 projections: computed once (f32), stored bf16. ---
    fb = (jnp.einsum("oc,bcn->bon", wb, x) + bb).astype(jnp.bfloat16)       # (B, C//8, HW)
    fct = (jnp.einsum("oc,bcn->bno", wc, x)
           + bc.reshape(1, 1, -1)).astype(jnp.bfloat16)                     # (B, HW, C//8)
    fd = (jnp.einsum("oc,bcn->bon", wd, x) + bd).astype(jnp.bfloat16)       # (B, C, HW)

    if tq is None or tk is None:
        dq, dk = _default_tiles(B, HW)
        tq = dq if tq is None else tq
        tk = dk if tk is None else tk
    assert HW % tq == 0 and HW % tk == 0, "H*W must be divisible by the tiles"
    n_q, n_k = HW // tq, HW // tk
    c8 = wb.shape[0]

    in_specs = [
        pl.BlockSpec((1, C, tq), lambda b, qi, ki: (b, 0, qi)),   # x query tile (f32 residual)
        pl.BlockSpec((1, C, 1), lambda b, qi, ki: (b, 0, 0)),     # CA gate
        pl.BlockSpec((1, c8, tq), lambda b, qi, ki: (b, 0, qi)),  # fb query tile (bf16)
        pl.BlockSpec((1, tk, c8), lambda b, qi, ki: (b, ki, 0)),  # fc^T key tile (bf16)
        pl.BlockSpec((1, C, tk), lambda b, qi, ki: (b, 0, ki)),   # fd value tile (bf16)
        pl.BlockSpec(memory_space=pltpu.MemorySpace.SMEM),        # alpha scalar
    ]
    out_spec = pl.BlockSpec((1, C, tq), lambda b, qi, ki: (b, 0, qi))

    out = pl.pallas_call(
        joint_attention_kernel,
        out_shape=jax.ShapeDtypeStruct((B, C, HW), jnp.float32),
        grid_spec=pltpu.PrefetchScalarGridSpec(
            num_scalar_prefetch=0,
            grid=(B, n_q, n_k),
            in_specs=in_specs,
            out_specs=out_spec,
            scratch_shapes=[
                pltpu.VMEM((1, tq), jnp.float32),        # running max m
                pltpu.VMEM((1, tq), jnp.float32),        # running sum l
                pltpu.VMEM((C, tq), jnp.float32),        # output accumulator
            ],
        ),
        compiler_params=pltpu.CompilerParams(
            dimension_semantics=("parallel", "parallel", "arbitrary"),
            vmem_limit_bytes=_vmem_limit_bytes(),
        ),
    )(x, gate, fb, fct, fd, alpha)

    return out.reshape(B, C, H, W)


def init_params(key, C):
    """Deterministic params matching the PyTorch module's shapes (BN folded)."""
    eps = 1e-5

    def conv_bn_fold(key, c_in, c_out):
        ks = jax.random.split(key, 6)
        w = 0.1 * jax.random.normal(ks[0], (c_out, c_in), jnp.float32)        # Conv2d 1x1
        b = 0.1 * jax.random.normal(ks[1], (c_out,), jnp.float32)             # Conv2d bias
        gamma = 1.0 + 0.1 * jax.random.normal(ks[2], (c_out,), jnp.float32)   # BN weight
        beta = 0.1 * jax.random.normal(ks[3], (c_out,), jnp.float32)          # BN bias
        mean = 0.1 * jax.random.normal(ks[4], (c_out,), jnp.float32)          # running_mean
        var = jnp.abs(jax.random.normal(ks[5], (c_out,), jnp.float32)) + 0.5  # running_var
        s = gamma / jnp.sqrt(var + eps)
        t = (b - mean) * s + beta
        return w.T, s, t                      # (in,out), (out,), (out,)

    def conv_only(key, c_in, c_out):
        ks = jax.random.split(key, 2)
        w = 0.1 * jax.random.normal(ks[0], (c_out, c_in), jnp.float32)   # PyTorch (out,in)
        b = 0.1 * jax.random.normal(ks[1], (c_out,), jnp.float32)
        return w, b.reshape(c_out, 1)

    keys = jax.random.split(key, 7)
    # ChannelAttention stack: C -> C//4 -> C//16 -> C//4 -> C (each conv+BN+ReLU)
    w1, s1, t1 = conv_bn_fold(keys[0], C, C // 4)
    w2, s2, t2 = conv_bn_fold(keys[1], C // 4, C // 16)
    w3, s3, t3 = conv_bn_fold(keys[2], C // 16, C // 4)
    w4, s4, t4 = conv_bn_fold(keys[3], C // 4, C)
    # PositionAttention 1x1 convs
    wb, bb = conv_only(keys[4], C, C // 8)
    wc, bc = conv_only(keys[5], C, C // 8)
    wd, bd = conv_only(keys[6], C, C)
    # PyTorch initializes alpha to 0; use a nonzero value so the test actually
    # exercises the position-attention path.
    alpha = jnp.full((1, 1), 0.5, jnp.float32)

    return [w1, s1, t1, w2, s2, t2, w3, s3, t3, w4, s4, t4,
            wb, bb, wc, bc, wd, bd, alpha]


def reference_jnp(x_nchw, p):
    """Pure-JAX f32 reference using the same folded params."""
    (w1, s1, t1, w2, s2, t2, w3, s3, t3, w4, s4, t4,
     wb, bb, wc, bc, wd, bd, alpha) = p
    B, C, H, W = x_nchw.shape
    HW = H * W
    x = x_nchw.reshape(B, C, HW)

    pooled = jnp.max(x, axis=2)                      # (B, C)
    h = jnp.maximum(pooled @ w1 * s1 + t1, 0.0)
    h = jnp.maximum(h @ w2 * s2 + t2, 0.0)
    h = jnp.maximum(h @ w3 * s3 + t3, 0.0)
    attn_c = jnp.maximum(h @ w4 * s4 + t4, 0.0)      # (B, C)
    x_c = x * attn_c[:, :, None]

    fb = jnp.einsum("oc,bcn->bon", wb, x) + bb       # (B, C//8, HW)
    fc = jnp.einsum("oc,bcn->bon", wc, x) + bc       # (B, C//8, HW)
    fd = jnp.einsum("oc,bcn->bon", wd, x) + bd       # (B, C, HW)
    energy = jnp.einsum("bci,bcj->bij", fb, fc)      # (B, HW, HW): query i, key j
    attn_s = jax.nn.softmax(energy, axis=-1)
    fe = jnp.einsum("bcj,bij->bci", fd, attn_s)      # (B, C, HW)
    x_p = alpha[0, 0] * fe + x

    out = x_c + x_p
    return out.reshape(B, C, H, W)


if __name__ == "__main__":
    B, C, H, W = 2, 32, 16, 16       # C divisible by 16 (module constraint); HW = 256
    key = jax.random.PRNGKey(0)
    kx, kp = jax.random.split(key)
    x = jax.random.normal(kx, (B, C, H, W), jnp.float32)

    params = init_params(kp, C)

    # tq=tk=128 exercises the multi-tile online-softmax path (grid = (2, 2, 2)).
    out = joint_attention(x, params, tq=128, tk=128)
    out = jax.block_until_ready(out)

    ref = reference_jnp(x, params)
    assert out.shape == (B, C, H, W)
    # bf16 MXU operands with f32 accumulation -> compare at bf16-level tolerance.
    np.testing.assert_allclose(np.asarray(out), np.asarray(ref), rtol=2e-2, atol=2e-2)

    print("KERNEL_OK")
</pallas_src>

<mosaic_0001>
module attributes {stable_mosaic.version = 11 : i64} {
  func.func @joint_attention_kernel(%arg0: i32, %arg1: i32, %arg2: i32, %arg3: memref<1x32x128xf32, #tpu.memory_space<vmem>>, %arg4: memref<1x32x1xf32, #tpu.memory_space<vmem>>, %arg5: memref<1x4x128xbf16, #tpu.memory_space<vmem>>, %arg6: memref<1x128x4xbf16, #tpu.memory_space<vmem>>, %arg7: memref<1x32x128xbf16, #tpu.memory_space<vmem>>, %arg8: memref<1x1xf32, #tpu.memory_space<smem>>, %arg9: memref<1x32x128xf32, #tpu.memory_space<vmem>>, %arg10: memref<1x128xf32, #tpu.memory_space<vmem>>, %arg11: memref<1x128xf32, #tpu.memory_space<vmem>>, %arg12: memref<32x128xf32, #tpu.memory_space<vmem>>) attributes {dimension_semantics = [#tpu.dimension_semantics<parallel>, #tpu.dimension_semantics<parallel>, #tpu.dimension_semantics<arbitrary>], iteration_bounds = array<i64: 2, 2, 2>, scalar_prefetch = 0 : i64, scratch_operands = 3 : i64, tpu.core_type = #tpu.core_type<tc>, window_params = [{transform_indices = @transform_0, window_bounds = array<i64: 1, 32, 128>}, {transform_indices = @transform_1, window_bounds = array<i64: 1, 32, 1>}, {transform_indices = @transform_2, window_bounds = array<i64: 1, 4, 128>}, {transform_indices = @transform_3, window_bounds = array<i64: 1, 128, 4>}, {transform_indices = @transform_4, window_bounds = array<i64: 1, 32, 128>}, {transform_indices = @transform_5, window_bounds = array<i64: 1, 1>}, {transform_indices = @transform_6, window_bounds = array<i64: 1, 32, 128>}]} {
    %c0_i32 = arith.constant 0 : i32
    %0 = arith.cmpi eq, %arg2, %c0_i32 : i32
    %1 = arith.extui %0 : i1 to i32
    %c0_i32_0 = arith.constant 0 : i32
    %2 = arith.cmpi ne, %1, %c0_i32_0 : i32
    scf.if %2 {
      %cst_25 = arith.constant 0xFF800000 : f32
      %36 = vector.broadcast %cst_25 : f32 to vector<1x128xf32>
      %c0_26 = arith.constant 0 : index
      %c0_27 = arith.constant 0 : index
      %37 = vector.load %arg10[%c0_26, %c0_27] : memref<1x128xf32, #tpu.memory_space<vmem>>, vector<1x128xf32>
      tpu.vector_store %arg10[%c0_26, %c0_27], %36 {strides = array<i32>} : memref<1x128xf32, #tpu.memory_space<vmem>>, vector<1x128xf32>,
      %cst_28 = arith.constant 0.000000e+00 : f32
      %38 = vector.broadcast %cst_28 : f32 to vector<1x128xf32>
      %c0_29 = arith.constant 0 : index
      %c0_30 = arith.constant 0 : index
      %39 = vector.load %arg11[%c0_29, %c0_30] : memref<1x128xf32, #tpu.memory_space<vmem>>, vector<1x128xf32>
      tpu.vector_store %arg11[%c0_29, %c0_30], %38 {strides = array<i32>} : memref<1x128xf32, #tpu.memory_space<vmem>>, vector<1x128xf32>,
      %cst_31 = arith.constant 0.000000e+00 : f32
      %40 = vector.broadcast %cst_31 : f32 to vector<32x128xf32>
      %c0_32 = arith.constant 0 : index
      %c0_33 = arith.constant 0 : index
      %41 = vector.load %arg12[%c0_32, %c0_33] : memref<32x128xf32, #tpu.memory_space<vmem>>, vector<32x128xf32>
      tpu.vector_store %arg12[%c0_32, %c0_33], %40 {strides = array<i32>} : memref<32x128xf32, #tpu.memory_space<vmem>>, vector<32x128xf32>,
    } else {
    }
    %c0 = arith.constant 0 : index
    %c0_1 = arith.constant 0 : index
    %c0_2 = arith.constant 0 : index
    %3 = vector.load %arg6[%c0, %c0_1, %c0_2] : memref<1x128x4xbf16, #tpu.memory_space<vmem>>, vector<1x128x4xbf16>
    %4 = vector.shape_cast %3 : vector<1x128x4xbf16> to vector<128x4xbf16>
    %c0_3 = arith.constant 0 : index
    %c0_4 = arith.constant 0 : index
    %c0_5 = arith.constant 0 : index
    %5 = vector.load %arg5[%c0_3, %c0_4, %c0_5] : memref<1x4x128xbf16, #tpu.memory_space<vmem>>, vector<1x4x128xbf16>
    %6 = vector.shape_cast %5 : vector<1x4x128xbf16> to vector<4x128xbf16>
    %cst = arith.constant dense<0.000000e+00> : vector<128x128xf32>
    %7 = tpu.matmul %4, %6, %cst {dimension_numbers = #tpu.dot_dimension_numbers<[1], [0], [0], [1], [0, 0, 1, 1], [], []>} : vector<128x4xbf16>, vector<4x128xbf16>, vector<128x128xf32> -> vector<128x128xf32>
    %c0_6 = arith.constant 0 : index
    %c0_7 = arith.constant 0 : index
    %8 = vector.load %arg10[%c0_6, %c0_7] : memref<1x128xf32, #tpu.memory_space<vmem>>, vector<1x128xf32>
    %cst_8 = arith.constant dense<0xFF800000> : vector<128xf32>
    %9 = vector.multi_reduction <maximumf>, %7, %cst_8 [0] : vector<128x128xf32> to vector<128xf32>
    %10 = vector.shape_cast %9 : vector<128xf32> to vector<1x128xf32>
    %11 = arith.maximumf %8, %10 : vector<1x128xf32>
    %12 = arith.subf %8, %11 : vector<1x128xf32>
    %13 = math.exp %12 : vector<1x128xf32>
    %14 = vector.broadcast %11 : vector<1x128xf32> to vector<128x128xf32>
    %15 = arith.subf %7, %14 : vector<128x128xf32>
    %16 = math.exp %15 : vector<128x128xf32>
    %c0_9 = arith.constant 0 : index
    %c0_10 = arith.constant 0 : index
    %17 = vector.load %arg11[%c0_9, %c0_10] : memref<1x128xf32, #tpu.memory_space<vmem>>, vector<1x128xf32>
    %18 = arith.mulf %13, %17 : vector<1x128xf32>
    %cst_11 = arith.constant dense<0.000000e+00> : vector<128xf32>
    %19 = vector.multi_reduction <add>, %16, %cst_11 [0] : vector<128x128xf32> to vector<128xf32>
    %20 = vector.shape_cast %19 : vector<128xf32> to vector<1x128xf32>
    %21 = arith.addf %18, %20 : vector<1x128xf32>
    %c0_12 = arith.constant 0 : index
    %c0_13 = arith.constant 0 : index
    %22 = vector.load %arg11[%c0_12, %c0_13] : memref<1x128xf32, #tpu.memory_space<vmem>>, vector<1x128xf32>
    tpu.vector_store %arg11[%c0_12, %c0_13], %21 {strides = array<i32>} : memref<1x128xf32, #tpu.memory_space<vmem>>, vector<1x128xf32>,
    %c0_14 = arith.constant 0 : index
    %c0_15 = arith.constant 0 : index
    %23 = vector.load %arg12[%c0_14, %c0_15] : memref<32x128xf32, #tpu.memory_space<vmem>>, vector<32x128xf32>
    %24 = vector.broadcast %13 : vector<1x128xf32> to vector<32x128xf32>
    %25 = arith.mulf %24, %23 : vector<32x128xf32>
    %c0_16 = arith.constant 0 : index
    %c0_17 = arith.constant 0 : index
    %c0_18 = arith.constant 0 : index
    %26 = vector.load %arg7[%c0_16, %c0_17, %c0_18] : memref<1x32x128xbf16, #tpu.memory_space<vmem>>, vector<1x32x128xbf16>
    %27 = vector.shape_cast %26 : vector<1x32x128xbf16> to vector<32x128xbf16>
    %28 = arith.truncf %16 : vector<128x128xf32> to vector<128x128xbf16>
    %cst_19 = arith.constant dense<0.000000e+00> : vector<32x128xf32>
    %29 = tpu.matmul %27, %28, %cst_19 {dimension_numbers = #tpu.dot_dimension_numbers<[1], [0], [0], [1], [0, 0, 1, 1], [], []>} : vector<32x128xbf16>, vector<128x128xbf16>, vector<32x128xf32> -> vector<32x128xf32>
    %30 = arith.addf %25, %29 : vector<32x128xf32>
    %c0_20 = arith.constant 0 : index
    %c0_21 = arith.constant 0 : index
    %31 = vector.load %arg12[%c0_20, %c0_21] : memref<32x128xf32, #tpu.memory_space<vmem>>, vector<32x128xf32>
    tpu.vector_store %arg12[%c0_20, %c0_21], %30 {strides = array<i32>} : memref<32x128xf32, #tpu.memory_space<vmem>>, vector<32x128xf32>,
    %c0_22 = arith.constant 0 : index
    %c0_23 = arith.constant 0 : index
    %32 = vector.load %arg10[%c0_22, %c0_23] : memref<1x128xf32, #tpu.memory_space<vmem>>, vector<1x128xf32>
    tpu.vector_store %arg10[%c0_22, %c0_23], %11 {strides = array<i32>} : memref<1x128xf32, #tpu.memory_space<vmem>>, vector<1x128xf32>,
    %c1_i32 = arith.constant 1 : i32
    %33 = arith.cmpi eq, %arg2, %c1_i32 : i32
    %34 = arith.extui %33 : i1 to i32
    %c0_i32_24 = arith.constant 0 : i32
    %35 = arith.cmpi ne, %34, %c0_i32_24 : i32
    scf.if %35 {
      %c0_25 = arith.constant 0 : index
      %c0_26 = arith.constant 0 : index
      %36 = vector.load %arg11[%c0_25, %c0_26] : memref<1x128xf32, #tpu.memory_space<vmem>>, vector<1x128xf32>
      %37 = tpu.reciprocal %36 {approx = true} : vector<1x128xf32> -> vector<1x128xf32>
      %c0_27 = arith.constant 0 : index
      %c0_28 = arith.constant 0 : index
      %38 = memref.load %arg8[%c0_27, %c0_28] : memref<1x1xf32, #tpu.memory_space<smem>>
      %c0_29 = arith.constant 0 : index
      %c0_30 = arith.constant 0 : index
      %c0_31 = arith.constant 0 : index
      %39 = vector.load %arg3[%c0_29, %c0_30, %c0_31] : memref<1x32x128xf32, #tpu.memory_space<vmem>>, vector<1x32x128xf32>
      %40 = vector.shape_cast %39 : vector<1x32x128xf32> to vector<32x128xf32>
      %c0_32 = arith.constant 0 : index
      %c0_33 = arith.constant 0 : index
      %c0_34 = arith.constant 0 : index
      %41 = vector.load %arg4[%c0_32, %c0_33, %c0_34] : memref<1x32x1xf32, #tpu.memory_space<vmem>>, vector<1x32x1xf32>
      %42 = vector.shape_cast %41 : vector<1x32x1xf32> to vector<32x1xf32>
      %43 = vector.broadcast %42 : vector<32x1xf32> to vector<32x128xf32>
      %44 = arith.mulf %40, %43 : vector<32x128xf32>
      %c0_35 = arith.constant 0 : index
      %c0_36 = arith.constant 0 : index
      %45 = vector.load %arg12[%c0_35, %c0_36] : memref<32x128xf32, #tpu.memory_space<vmem>>, vector<32x128xf32>
      %46 = vector.broadcast %37 : vector<1x128xf32> to vector<32x128xf32>
      %47 = arith.mulf %45, %46 : vector<32x128xf32>
      %48 = vector.broadcast %38 : f32 to vector<32x128xf32>
      %49 = arith.mulf %48, %47 : vector<32x128xf32>
      %50 = arith.addf %44, %49 : vector<32x128xf32>
      %c0_37 = arith.constant 0 : index
      %c0_38 = arith.constant 0 : index
      %c0_39 = arith.constant 0 : index
      %51 = vector.load %arg9[%c0_37, %c0_38, %c0_39] : memref<1x32x128xf32, #tpu.memory_space<vmem>>, vector<1x32x128xf32>
      %52 = vector.shape_cast %51 : vector<1x32x128xf32> to vector<32x128xf32>
      %53 = vector.shape_cast %50 : vector<32x128xf32> to vector<1x32x128xf32>
      tpu.vector_store %arg9[%c0_37, %c0_38, %c0_39], %53 {strides = array<i32>} : memref<1x32x128xf32, #tpu.memory_space<vmem>>, vector<1x32x128xf32>,
    } else {
    }
    return
  }
  func.func @transform_0(%arg0: i32, %arg1: i32, %arg2: i32) -> (i32, i32, i32) {
    %c0_i32 = arith.constant 0 : i32
    %c0_i32_0 = arith.constant 0 : i32
    return %arg0, %c0_i32, %arg1 : i32, i32, i32
  }
  func.func @transform_1(%arg0: i32, %arg1: i32, %arg2: i32) -> (i32, i32, i32) {
    %c0_i32 = arith.constant 0 : i32
    %c0_i32_0 = arith.constant 0 : i32
    %c0_i32_1 = arith.constant 0 : i32
    return %arg0, %c0_i32, %c0_i32_0 : i32, i32, i32
  }
  func.func @transform_2(%arg0: i32, %arg1: i32, %arg2: i32) -> (i32, i32, i32) {
    %c0_i32 = arith.constant 0 : i32
    %c0_i32_0 = arith.constant 0 : i32
    return %arg0, %c0_i32, %arg1 : i32, i32, i32
  }
  func.func @transform_3(%arg0: i32, %arg1: i32, %arg2: i32) -> (i32, i32, i32) {
    %c0_i32 = arith.constant 0 : i32
    %c0_i32_0 = arith.constant 0 : i32
    return %arg0, %arg2, %c0_i32 : i32, i32, i32
  }
  func.func @transform_4(%arg0: i32, %arg1: i32, %arg2: i32) -> (i32, i32, i32) {
    %c0_i32 = arith.constant 0 : i32
    %c0_i32_0 = arith.constant 0 : i32
    return %arg0, %c0_i32, %arg2 : i32, i32, i32
  }
  func.func @transform_5(%arg0: i32, %arg1: i32, %arg2: i32) -> (i32, i32) {
    %c0_i32 = arith.constant 0 : i32
    %c0_i32_0 = arith.constant 0 : i32
    %c0_i32_1 = arith.constant 0 : i32
    return %c0_i32, %c0_i32_0 : i32, i32
  }
  func.func @transform_6(%arg0: i32, %arg1: i32, %arg2: i32) -> (i32, i32, i32) {
    %c0_i32 = arith.constant 0 : i32
    %c0_i32_0 = arith.constant 0 : i32
    return %arg0, %c0_i32, %arg1 : i32, i32, i32
  }
}

</mosaic_0001>

<bundles_post_ra>
// kernel: tpu_custom_call.1
= control target key start
LH: loop header
LB: loop body
LE: loop exit
PB: predicated region body
PF: predicated region fallthrough
CT: control target
= control target key end

     0   :  { %s1750_s0 = inlined_call_operand.vmem [shape: f32[2,32,256], index: 0, kind: input, shape index: {}]   ;;  %s1751_s1 = inlined_call_operand.vmem [shape: f32[2,32,1], index: 1, kind: input, shape index: {}]   ;;  %s1752_s2 = inlined_call_operand.vmem [shape: bf16[2,4,256], index: 2, kind: input, shape index: {}]   ;;  %s1753_s3 = inlined_call_operand.vmem [shape: bf16[2,256,4], index: 3, kind: input, shape index: {}]   ;;  %s1754_s4 = inlined_call_operand.vmem [shape: bf16[2,32,256], index: 4, kind: input, shape index: {}]   ;;  %s1755_s5 = inlined_call_operand.<no memory space> [shape: f32[1,1], index: 5, kind: input, shape index: {}]   ;;  %s1756_s6 = inlined_call_operand.hbm [shape: f32[2,32,256], index: 6, kind: output, shape index: {}]  }
   0x1   :  { %1768 = sst [smem:[#allocation21_spill]] %s1750_s0 }
   0x2   :  { %1769 = sst [smem:[#allocation22_spill]] %s1754_s4 }
   0x3   :  { %1770 = sst [smem:[#allocation23_spill]] %s1756_s6 }
   0x4   :  { %11 = sst [smem:[#allocation5]] %s1755_s5 }
   0x5   :  { %12 = vsyncpa [#allocation9], 0 }
   0x6   :  { %14 = vsyncpa [#allocation9 + $0x1], 0  ;;  %s1453_s23 = smov 0   ;;  %s1455_s24 = smov 0  }
   0x7   :  { %s1457_s25 = smov 0   ;;  %s1459_s26 = smov 0  }
   0x8   :  { %s1461_s27 = smov 0   ;;  %s1463_s28 = smov 0  }
   0x9   :  { %s1465_s29 = smov 0   ;;  %s1467_s30 = smov 0  }
   0xa   :  { %s1469_s7 = smov 0   ;;  %s1471_s5 = smov 0  }
   0xb   :  { %s1473_s8 = smov 0   ;;  %s1475_s9 = smov 0  }
   0xc LB: > { %1771 = sst [smem:[#allocation11_spill]] %s1363_s23  ;;  %s1037_s10 = sadd.s32 4294967295, %s1407_s9   ;;  %s1407_s9 = sphi %s1475_s9, %s20_s9   ;;  %s1403_s8 = sphi %s1473_s8, %s1798_s8   ;;  %s1399_s5 = sphi %s1471_s5, %s1797_s5   ;;  %s1395_s7 = sphi %s1469_s7, %s1796_s7   ;;  %s1391_s30 = sphi %s1467_s30, %s1795_s30   ;;  %s1387_s29 = sphi %s1465_s29, %s1794_s29   ;;  %s1383_s28 = sphi %s1463_s28, %s1793_s28   ;;  %s1379_s27 = sphi %s1461_s27, %s1792_s27   ;;  %s1375_s26 = sphi %s1459_s26, %s1802_s26   ;;  %s1371_s25 = sphi %s1457_s25, %s1801_s25   ;;  %s1367_s24 = sphi %s1455_s24, %s1800_s24   ;;  %s1363_s23 = sphi %s1453_s23, %s1799_s23  }
   0xd   : > { %1772 = sst [smem:[#allocation12_spill]] %s1379_s27  ;;  %s1038_s11 = sadd.s32 4294967294, %s1407_s9  }
   0xe   : > { %1773 = sst [smem:[#allocation13_spill]] %s1395_s7  ;;  %s32_s12 = sadd.s32 1, %s1395_s7 }
   0xf   : > { %1774 = sst [smem:[#allocation14_spill]] %s1399_s5  ;;  %p33_p0 = scmp.ge.s32.totalorder %s32_s12, 2 }
  0x10   : > { %1775 = sst [smem:[#allocation15_spill]] %s1403_s8  ;;  %s35_s13 = sadd.s32 1, %s1399_s5 }
  0x11   : > { %s39_s14 = sadd.s32 1, %s1403_s8  ;;  %p55_p1 = scmp.ne.s32.totalorder %s1379_s27, %s1375_s26 }
  0x12   : > { %s1804_s12 = smov (%p33_p0, %s32_s12), 0  ;;  %s1806_s13 = smov (!%p33_p0, %s35_s13), %s1399_s5 }
  0x13   : > { %1776 = sst [smem:[#allocation16_spill]] %s1804_s12  ;;  %s48_s15 = sadd.s32 1, %s1379_s27 }
  0x14   : > { %p56_p2 = scmp.eq.s32.totalorder %s1407_s9, 0  ;;  %p37_p3 = scmp.ge.s32.totalorder %s1806_s13, 2 }
  0x15   : > { %s154_s16 = ssub.s32 %s1395_s7, %s1804_s12  ;;  %p165_p5 = scmp.ne.s32.totalorder %s1371_s25, %s1367_s24 }
  0x16   : > { %p1530_p4 = por %p56_p2, %p55_p1  ;;  %s1808_s13 = smov (%p37_p3, %s1806_s13), 0 }
  0x17   : > { %1778 = sst [smem:[#allocation17_spill]] %s1808_s13  ;;  %s1810_s14 = smov (!%p37_p3, %s39_s14), %s1403_s8 }
  0x18   : > { %s44_s18 = ssub.s32 %s1399_s5, %s1808_s13  ;;  %p1541_p6 = por %p165_p5, %p56_p2 }
  0x19   : > { %p41_p7 = scmp.ge.s32.totalorder %s1810_s14, 2  ;;  %p218_p8 = scmp.eq.s32.totalorder %s1037_s10, 7 }
  0x1a   : > { %p223_p9 = scmp.ne.s32.totalorder %s1375_s26, %s1363_s23  ;;  %p224_p10 = scmp.eq.s32.totalorder %s1038_s11, 7 }
  0x1b   : > { %s1812_s14 = smov (%p41_p7, %s1810_s14), 0  ;;  %p1552_p11 = por %p218_p8, %p55_p1 }
  0x1c   : > { %1780 = sst [smem:[#allocation18_spill]] %s1812_s14  ;;  %p1556_p12 = por %p224_p10, %p223_p9 }
  0x1d   : > { %s43_s22 = ssub.s32 %s1403_s8, %s1812_s14  ;;  %s158_s13 = sadd.s32 1, %s1371_s25 }
  0x1e   : > { %s1782_s21 = scalar_select %p1556_p12, 1, 0 }
  0x1f   : > { %s45_s12 = sor.u32 %s44_s18, %s43_s22  ;;  %s155_s6 = sor.u32 %s154_s16, %s43_s22 }
  0x20   : > { %1783 = sst [smem:[#allocation19_spill]] %s1782_s21  ;;  %p46_p13 = scmp.eq.s32.totalorder %s45_s12, 0 }
  0x21   : > { %p156_p0 = scmp.eq.s32.totalorder %s155_s6, 0  ;;  %p1040_p2 = scmp.ge.s32.totalorder %s1407_s9, 8 }
  0x22   : > { %s1564_s10 = scalar_select %p46_p13, %s1379_s27, %s48_s15  }
  0x23   : > { %s1567_s11 = scalar_select %p156_p0, %s1371_s25, %s158_s13  }
  0x24   : > { %1784 = sst [smem:[#allocation20_spill]] %s1564_s10  ;;  %243 = sbr.rel (%p1040_p2) target bundleno = 69 (0x45), region = 20 }
  0x29   : > { %246 = sbr.rel (!%p1530_p4) target bundleno = 55 (0x37), region = 24  ;;  %s248_s21 = sand.u32 (%p1530_p4), 1, %s1379_s27  }
  0x2a   : > { %s1042_s14 = sshll.u32 (%p1530_p4), %s1403_s8, 3  ;;  %s1041_s23 = sshll.u32 (%p1530_p4), %s248_s21, 5 }
  0x2b   : > { %s252_s18 = sadd.s32 (%p1530_p4), %s1399_s5, %s1042_s14  ;;  %s1785_s0 = sld [smem:[#allocation21_spill]] (%p1530_p4) }
  0x2c   : > { %s1043_s16 = sshll.u32 (%p1530_p4), %s252_s18, 3  ;;  %s250_s13 = scalar_lea.vmem (%p1530_p4), [#allocation6], %s1041_s23 }
  0x31   : > { %s254_s15 = scalar_lea.vmem %s1785_s0, %s1043_s16 }
  0x32   : > { %v289_v0 = vld [vmem:[%s254_s15] sm:$0xff]  ;;  %v291_v1 = vld [vmem:[%s254_s15 + $0x10] sm:$0xff] }
  0x33   : > { %v293_v2 = vld [vmem:[%s254_s15 + $0x20] sm:$0xff]  ;;  %290 = vst [vmem:[%s250_s13] sm:$0xff] %v289_v0  ;;  %v295_v3 = vld [vmem:[%s254_s15 + $0x30] sm:$0xff] }
  0x34   : > { %292 = vst [vmem:[%s250_s13 + $0x8] sm:$0xff] %v291_v1 }
  0x35   : > { %294 = vst [vmem:[%s250_s13 + $0x10] sm:$0xff] %v293_v2 }
  0x36   : > { %296 = vst [vmem:[%s250_s13 + $0x18] sm:$0xff] %v295_v3 }
  0x37 PF: > { %334 = sbr.rel (!%p1541_p6) target bundleno = 69 (0x45), region = 74  ;;  %s336_s14 = sand.u32 (%p1541_p6), 1, %s1371_s25  }
  0x38   : > { %s1045_s17 = sshll.u32 (%p1541_p6), %s1403_s8, 3  ;;  %s1044_s21 = sshll.u32 (%p1541_p6), %s336_s14, 4 }
  0x39   : > { %s340_s22 = sadd.s32 (%p1541_p6), %s1395_s7, %s1045_s17  ;;  %s1786_s4 = sld [smem:[#allocation22_spill]] (%p1541_p6) }
  0x3a   : > { %s1046_s18 = sshll.u32 (%p1541_p6), %s340_s22, 2  ;;  %s338_s6 = scalar_lea.vmem (%p1541_p6), [#allocation7], %s1044_s21 }
  0x3f   : > { %s342_s23 = scalar_lea.vmem %s1786_s4, %s1046_s18 }
  0x40   : > { %v359_v4 = vld [vmem:[%s342_s23] sm:$0xf]  ;;  %v361_v5 = vld [vmem:[%s342_s23 + $0x8] sm:$0xf]  ;;  %v363_v6 = vld [vmem:[%s342_s23 + $0x10] sm:$0xf] }
  0x41   : > { %360 = vst [vmem:[%s338_s6] sm:$0xf] %v359_v4  ;;  %v365_v7 = vld [vmem:[%s342_s23 + $0x18] sm:$0xf] }
  0x42   : > { %362 = vst [vmem:[%s338_s6 + $0x4] sm:$0xf] %v361_v5 }
  0x43   : > { %364 = vst [vmem:[%s338_s6 + $0x8] sm:$0xf] %v363_v6 }
  0x44   : > { %366 = vst [vmem:[%s338_s6 + $0xc] sm:$0xf] %v365_v7 }
  0x45 PF: > { %p1047_p1 = scmp.ge.s32.totalorder %s1407_s9, 1  ;;  %p397_p3 = scmp.lt.s32.totalorder %s1407_s9, 9 }
  0x47   : > { %p398_p4 = pnand %p1047_p1, %p397_p3 }
  0x48   : > { %s1763_s19 = sand.u32 (!%p398_p4), 1, %s1375_s26   ;;  %s411_s15 = sand.u32 (!%p398_p4), 1, %s1367_s24  }
  0x49   : > { %401 = sbr.rel (%p398_p4) target bundleno = 649 (0x289), region = 115  ;;  %s1048_s13 = sshll.u32 (!%p398_p4), %s1763_s19, 5 }
  0x4a   : > { %s1592_s14 = sshll.u32 (!%p398_p4), %s411_s15, 4  ;;  %p466_p5 = scmp.lt.s32.totalorder (!%p398_p4), %s1391_s30, 1 }
  0x4b   : > { %p473_p6 = scmp.lt.s32.totalorder (!%p398_p4), %s1387_s29, 1  ;;  %s1055_s17 = sshll.u32 (!%p398_p4), %s1383_s28, 4 }
  0x4c   : > { %p482_p7 = scmp.lt.s32.totalorder (!%p398_p4), %s1055_s17, 31  ;;  %s413_s12 = scalar_lea.vmem (!%p398_p4), [#allocation7], %s1592_s14 }
  0x4d   : > { %s1615_s23 = scalar_lea.vmem (!%p398_p4), [#allocation8], %s1048_s13  ;;  %p1058_p8 = scmp.ne.s32.totalorder (!%p398_p4), %s1383_s28, 0 }
  0x4e   : > { %s467_s21 = scalar_select %p466_p5, %s1391_s30, 1 }
  0x4f   : > { %s474_s22 = scalar_select %p473_p6, %s1387_s29, 1 }
  0x50   : > { %s1113_s18 = sshll.u32 %s467_s21, 5  ;;  %s1053_s16 = sshll.u32 %s467_s21, 1 }
  0x51   : > { %s1602_s6 = scalar_lea.vmem %s1751_s1, %s1113_s18  ;;  %s476_s0 = sadd.s32 %s1053_s16, %s474_s22 }
  0x52   : > { %s1054_s4 = sshll.u32 %s476_s0, 1  ;;  %s1814_s17 = smov (!%p482_p7, %s1055_s17), 31 }
  0x53   : > { %s478_s15 = scalar_lea.vmem %s1752_s2, %s1054_s4  ;;  %s485_s8 = sadd.s32 %s1113_s18, %s1814_s17 }
  0x54   : > { %s1057_s5 = sshll.u32 %s485_s8, 2  ;;  %s1612_s21 = scalar_lea.vmem [#allocation6], %s1048_s13 }
  0x55   : > { %s1610_s27 = scalar_lea.vmem %s1753_s3, %s1057_s5  ;;  %493 = sbr.rel (%p1058_p8) target bundleno = 97 (0x61), region = 127 }
  0x5a   : > { %v1409_v8 = vmov -inf   ;;  %v1410_v9 = vmov 0.0  }
  0x5b   : > { %494 = vst [vmem:[#allocation2] sm:$0x1] %v1409_v8 }
  0x5c   : > { %495 = vst [vmem:[#allocation3] sm:$0x1] %v1410_v9 }
  0x5d   : > { %496 = vst [vmem:[#allocation4 + $0x10] sm:$0xff] %v1410_v9 }
  0x5e   : > { %497 = vst [vmem:[#allocation4] sm:$0xff] %v1410_v9 }
  0x5f   : > { %498 = vst [vmem:[#allocation4 + $0x18] sm:$0xff] %v1410_v9 }
  0x60   : > { %499 = vst [vmem:[#allocation4 + $0x8] sm:$0xff] %v1410_v9 }
  0x61 PF: > { %v516_v10 = vld [vmem:[%s478_s15] sm:$0x3]  ;;  %vm582_vm0 = vcmask 1041408   ;;  %v1117_v13 = vld [vmem:[%s1610_s27 + $0x18] sm:$0xff]  ;;  %vm557_vm1 = vcmask 31744   ;;  %v1120_v14 = vld [vmem:[%s1610_s27 + $0x30] sm:$0xff] }
  0x62   : > { %v584_v11 = vsel %vm582_vm0, %v516_v10, 0  ;;  %v1114_v12 = vld [vmem:[%s1610_s27] sm:$0xff]  ;;  %v1115_v15 = vld [vmem:[%s1610_s27 + $0x8] sm:$0xff]  ;;  %v1121_v17 = vld [vmem:[%s1610_s27 + $0x38] sm:$0xff]  ;;  %p1107_p9 = scmp.ne.s32.totalorder %s1383_s28, 1 }
  0x63   : > { %593 = vmatpush.bf16.msra.mxu0 %v584_v11  ;;  %1124 = vmatpush.bf16.msra.mxu2 %v584_v11  ;;  %v1118_v16 = vld [vmem:[%s1610_s27 + $0x20] sm:$0xff]  ;;  %v1116_v18 = vld [vmem:[%s1610_s27 + $0x10] sm:$0xff]  ;;  %v1119_v19 = vld [vmem:[%s1610_s27 + $0x28] sm:$0xff]  ;;  %s806_s0 = sld [smem:[#allocation5]] (!%p1107_p9) }
  0x64   : > { %1125 = vmatpush.bf16.msra.mxu3 %v584_v11  ;;  %v1644_v56 = vld [vmem:[#allocation2] sm:$0x1] }
  0x66   : > { %1091 = vmatmul.msk.bf16.vlgmr.msra.gmra.mxu0 %vm557_vm1, %v1114_v12  ;;  %1094 = vmatmul.msk.bf16.vlgmr.msra.gmra.mxu2 %vm557_vm1, %v1117_v13 }
  0x67   : > { %1097 = vmatmul.msk.bf16.vlgmr.msra.gmra.mxu3 %vm557_vm1, %v1120_v14 }
  0x76   : > { %1092 = vmatmul.msk.bf16.gmra.mxu0 %vm557_vm1, %v1115_v15  ;;  %1095 = vmatmul.msk.bf16.gmra.mxu2 %vm557_vm1, %v1118_v16 }
  0x77   : > { %1098 = vmatmul.msk.bf16.gmra.mxu3 %vm557_vm1, %v1121_v17 }
  0x86   : > { %1093 = vmatmul.msk.bf16.gmra.mxu0 %vm557_vm1, %v1116_v18  ;;  %1096 = vmatmul.msk.bf16.gmra.mxu2 %vm557_vm1, %v1119_v19 }
  0xe3   : > { %v595_v20 = vpop.f32.mrf.mxu0 }
  0xe9   : > { %v610_v21 = vpop.f32.mrf.mxu2 }
  0xea   : > { %v1626_v25 = vpop.f32.mrf.mxu3 }
  0xeb   : > { %v597_v22 = vpop.f32.mrf.mxu0 }
  0xf1   : > { %v612_v23 = vpop.f32.mrf.mxu2 }
  0xf2   : > { %v1630_v28 = vpop.f32.mrf.mxu3 }
  0xf3   : > { %v600_v24 = vpop.f32.mrf.mxu0 }
  0xf4   : > { %v638_v36 = vmax.f32 %v600_v24, %v610_v21 }
  0xf9   : > { %v1628_v26 = vpop.f32.mrf.mxu2 }
  0xfa   : > { %v630_v31 = vpop.f32.mrf.mxu3 }
  0xfb   : > { %v602_v27 = vpop.f32.mrf.mxu0 }
  0xfc   : > { %v639_v38 = vmax.f32 %v602_v27, %v612_v23 }
 0x101   : > { %v1632_v29 = vpop.f32.mrf.mxu2 }
 0x102   : > { %v632_v44 = vpop.f32.mrf.mxu3 }
 0x103   : > { %v605_v30 = vpop.f32.mrf.mxu0 }
 0x104   : > { %v636_v34 = vmax.f32 %v595_v20, %v605_v30 }
 0x106   : > { %v640_v39 = vmax.f32 %v636_v34, %v1628_v26 }
 0x108   : > { %v644_v45 = vmax.f32 %v640_v39, %v1626_v25 }
 0x109   : > { %v1634_v32 = vpop.f32.mrf.mxu2 }
 0x10a   : > { %v642_v40 = vmax.f32 %v638_v36, %v1634_v32 }
 0x10b   : > { %v607_v33 = vpop.f32.mrf.mxu0 }
 0x10c   : > { %v637_v35 = vmax.f32 %v597_v22, %v607_v33  ;;  %v646_v46 = vmax.f32 %v642_v40, %v630_v31 }
 0x10e   : > { %v641_v37 = vmax.f32 %v637_v35, %v1632_v29 }
 0x110   : > { %v645_v42 = vmax.f32 %v641_v37, %v1630_v28 }
 0x111   : > { %v1639_v41 = vpop.f32.mrf.mxu2 }
 0x112   : > { %v643_v43 = vmax.f32 %v639_v38, %v1639_v41  ;;  %v648_v48 = vmax.f32 %v644_v45, %v645_v42 }
 0x114   : > { %v647_v47 = vmax.f32 %v643_v43, %v632_v44 }
 0x116   : > { %v649_v49 = vmax.f32 %v646_v46, %v647_v47 }
 0x118   : > { %v650_v50 = vmax.f32 %v648_v48, %v649_v49 }
 0x11a   : > { %v651_v51 = vrot.slane %v650_v50, 4 }
 0x11c   : > { %v652_v52 = vmax.f32 %v650_v50, %v651_v51 }
 0x11e   : > { %v653_v53 = vrot.slane %v652_v52, 2 }
 0x120   : > { %v654_v54 = vmax.f32 %v652_v52, %v653_v53 }
 0x122   : > { %v655_v55 = vrot.slane %v654_v54, 1 }
 0x124   : > { %v656_v57 = vmax.f32 %v654_v54, %v655_v55 }
 0x126   : > { %v1647_v58 = vmax.f32 %v1644_v56, %v656_v57 }
 0x128   : > { %v662_v59 = vperm.slane %v1647_v58, 0  ;;  %799 = vst [vmem:[#allocation2] sm:$0x1] %v1647_v58 }
 0x12a   : > { %v664_v60 = vsub.f32 %v595_v20, %v662_v59  ;;  %v665_v61 = vsub.f32 %v597_v22, %v662_v59  ;;  %v666_v62 = vsub.f32 %v600_v24, %v662_v59  ;;  %v667_v63 = vsub.f32 %v602_v27, %v662_v59 }
 0x12b   : > { %v668_v0 = vsub.f32 %v605_v30, %v662_v59  ;;  %v670_v1 = vsub.f32 %v610_v21, %v662_v59  ;;  %v671_v4 = vsub.f32 %v612_v23, %v662_v59  ;;  %v669_v7 = vsub.f32 %v607_v33, %v662_v59 }
 0x12c   : > { %v680_v2 = vmul.f32 1.442695, %v664_v60  ;;  %v682_v3 = vmul.f32 1.442695, %v665_v61  ;;  %v684_v5 = vmul.f32 1.442695, %v666_v62  ;;  %v672_v10 = vsub.f32 %v1628_v26, %v662_v59 }
 0x12d   : > { %v686_v6 = vmul.f32 1.442695, %v667_v63  ;;  %v688_v8 = vmul.f32 1.442695, %v668_v0  ;;  %v692_v9 = vmul.f32 1.442695, %v670_v1  ;;  %v678_v12 = vsub.f32 %v630_v31, %v662_v59 }
 0x12e   : > { %1243 = vpow2.f32 %v680_v2  ;;  %v694_v11 = vmul.f32 1.442695, %v671_v4  ;;  %v690_v13 = vmul.f32 1.442695, %v669_v7  ;;  %v679_v14 = vsub.f32 %v632_v44, %v662_v59 }
 0x12f   : > { %1245 = vpow2.f32 %v682_v3  ;;  %v676_v16 = vsub.f32 %v1626_v25, %v662_v59  ;;  %v696_v18 = vmul.f32 1.442695, %v672_v10  ;;  %v677_v19 = vsub.f32 %v1630_v28, %v662_v59 }
 0x130   : > { %1247 = vpow2.f32 %v684_v5  ;;  %v708_v21 = vmul.f32 1.442695, %v678_v12  ;;  %v673_v23 = vsub.f32 %v1632_v29, %v662_v59  ;;  %v710_v24 = vmul.f32 1.442695, %v679_v14  ;;  %v1122_v14 = vld [vmem:[%s413_s12] sm:$0xff] }
 0x131   : > { %1249 = vpow2.f32 %v686_v6  ;;  %v674_v25 = vsub.f32 %v1634_v32, %v662_v59  ;;  %v704_v30 = vmul.f32 1.442695, %v676_v16  ;;  %v675_v28 = vsub.f32 %v1639_v41, %v662_v59  ;;  %v1123_v16 = vld [vmem:[%s413_s12 + $0x8] sm:$0xff] }
 0x132   : > { %1251 = vpow2.f32 %v688_v8  ;;  %v706_v33 = vmul.f32 1.442695, %v677_v19  ;;  %v698_v29 = vmul.f32 1.442695, %v673_v23  ;;  %v658_v62 = vsub.f32 %v1644_v56, %v1647_v58 }
 0x133   : > { %1253 = vpow2.f32 %v692_v9  ;;  %v700_v37 = vmul.f32 1.442695, %v674_v25  ;;  %v702_v40 = vmul.f32 1.442695, %v675_v28  ;;  %v712_v9 = vld [vmem:[#allocation3] sm:$0x1] }
 0x134   : > { %v1652_v15 = vpop.eup %1243  ;;  %1255 = vpow2.f32 %v694_v11  ;;  %v659_v2 = vmul.f32 1.442695, %v658_v62  ;;  %v740_v28 = vld [vmem:[#allocation4 + $0x8] sm:$0xff] }
 0x135   : > { %v1655_v17 = vpop.eup %1245  ;;  %1257 = vpow2.f32 %v690_v13 }
 0x136   : > { %v714_v20 = vadd.f32 %v1655_v17, %v1652_v15  ;;  %v1660_v22 = vpop.eup %1247  ;;  %1259 = vpow2.f32 %v696_v18  ;;  %v752_v12 = vpack.c.bf16 %v1655_v17, %v1652_v15 }
 0x137   : > { %v1663_v26 = vpop.eup %1249  ;;  %1261 = vpow2.f32 %v708_v21 }
 0x138   : > { %v715_v27 = vadd.f32 %v1660_v22, %v714_v20  ;;  %v1252_v31 = vpop.eup %1251  ;;  %1263 = vpow2.f32 %v710_v24  ;;  %v753_v56 = vpack.c.bf16 %v1663_v26, %v1660_v22  ;;  %v737_v20 = vld [vmem:[#allocation4 + $0x10] sm:$0xff]  ;;  %v739_v24 = vld [vmem:[#allocation4 + $0x18] sm:$0xff] }
 0x139   : > { %v1254_v34 = vpop.eup %1253  ;;  %1265 = vpow2.f32 %v704_v30 }
 0x13a   : > { %v716_v35 = vadd.f32 %v1663_v26, %v715_v27  ;;  %v1256_v36 = vpop.eup %1255  ;;  %1267 = vpow2.f32 %v706_v33  ;;  %v738_v26 = vld [vmem:[#allocation4] sm:$0xff] }
 0x13b   : > { %v755_v39 = vpack.c.bf16 %v1256_v36, %v1254_v34  ;;  %v1258_v32 = vpop.eup %1257  ;;  %1269 = vpow2.f32 %v698_v29 }
 0x13c   : > { %v717_v38 = vadd.f32 %v1252_v31, %v716_v35  ;;  %v1260_v43 = vpop.eup %1259  ;;  %1271 = vpow2.f32 %v700_v37  ;;  %v754_v6 = vpack.c.bf16 %v1258_v32, %v1252_v31 }
 0x13d   : > { %v1262_v41 = vpop.eup %1261  ;;  %1273 = vpow2.f32 %v702_v40 }
 0x13e   : > { %v718_v42 = vadd.f32 %v1258_v32, %v717_v38  ;;  %v1264_v45 = vpop.eup %1263  ;;  %1275 = vpow2.f32 %v659_v2 }
 0x13f   : > { %v1266_v46 = vpop.eup %1265  ;;  %v759_v48 = vpack.c.bf16 %v1264_v45, %v1262_v41 }
 0x140   : > { %v719_v44 = vadd.f32 %v1254_v34, %v718_v42  ;;  %v1268_v49 = vpop.eup %1267 }
 0x141   : > { %772 = vmatpush.bf16.msra.mxu1 %v759_v48  ;;  %1126 = vmatpush.bf16.msrb.mxu3 %v759_v48  ;;  %v1270_v51 = vpop.eup %1269  ;;  %v758_v54 = vpack.c.bf16 %v1268_v49, %v1266_v46 }
 0x142   : > { %v720_v47 = vadd.f32 %v1256_v36, %v719_v44  ;;  %v1272_v52 = vpop.eup %1271  ;;  %v756_v0 = vpack.c.bf16 %v1270_v51, %v1260_v43 }
 0x143   : > { %v1274_v55 = vpop.eup %1273 }
 0x144   : > { %v721_v50 = vadd.f32 %v1260_v43, %v720_v47  ;;  %v757_v60 = vpack.c.bf16 %v1274_v55, %v1272_v52  ;;  %v1276_v58 = vpop.eup %1275 }
 0x145   : > { %773 = vmatpush.bf16.msra.mxu1 %v758_v54  ;;  %1127 = vmatpush.bf16.msrb.mxu3 %v758_v54  ;;  %v713_v13 = vmul.f32 %v1276_v58, %v712_v9  ;;  %v742_v19 = vperm.slane %v1276_v58, 0 }
 0x146   : > { %v722_v53 = vadd.f32 %v1270_v51, %v721_v50 }
 0x147   : > { %v744_v21 = vmul.f32 %v742_v19, %v737_v20  ;;  %v746_v15 = vmul.f32 %v742_v19, %v739_v24  ;;  %v745_v27 = vmul.f32 %v742_v19, %v738_v26  ;;  %v747_v33 = vmul.f32 %v742_v19, %v740_v28 }
 0x148   : > { %v723_v57 = vadd.f32 %v1272_v52, %v722_v53 }
 0x149   : > { %774 = vmatpush.bf16.msra.mxu1 %v757_v60  ;;  %1128 = vmatpush.bf16.msrb.mxu3 %v757_v60 }
 0x14a   : > { %v724_v59 = vadd.f32 %v1274_v55, %v723_v57 }
 0x14c   : > { %v725_v61 = vadd.f32 %v1266_v46, %v724_v59 }
 0x14d   : > { %775 = vmatpush.bf16.msra.mxu1 %v756_v0  ;;  %1129 = vmatpush.bf16.msrb.mxu3 %v756_v0 }
 0x14e   : > { %v726_v63 = vadd.f32 %v1268_v49, %v725_v61 }
 0x150   : > { %v727_v1 = vadd.f32 %v1262_v41, %v726_v63 }
 0x151   : > { %776 = vmatpush.bf16.msra.mxu1 %v755_v39  ;;  %1130 = vmatpush.bf16.msrb.mxu3 %v755_v39 }
 0x152   : > { %v728_v3 = vadd.f32 %v1264_v45, %v727_v1 }
 0x154   : > { %v729_v4 = vrot.slane %v728_v3, 4 }
 0x155   : > { %777 = vmatpush.bf16.msra.mxu1 %v754_v6  ;;  %1131 = vmatpush.bf16.msrb.mxu3 %v754_v6 }
 0x156   : > { %v730_v5 = vadd.f32 %v729_v4, %v728_v3 }
 0x158   : > { %v731_v7 = vrot.slane %v730_v5, 2 }
 0x159   : > { %778 = vmatpush.bf16.msra.mxu1 %v753_v56  ;;  %1132 = vmatpush.bf16.msrb.mxu3 %v753_v56 }
 0x15a   : > { %v732_v8 = vadd.f32 %v731_v7, %v730_v5 }
 0x15c   : > { %v733_v10 = vrot.slane %v732_v8, 1 }
 0x15d   : > { %779 = vmatpush.bf16.msra.mxu1 %v752_v12  ;;  %1133 = vmatpush.bf16.msrb.mxu3 %v752_v12 }
 0x15e   : > { %v734_v11 = vadd.f32 %v733_v10, %v732_v8 }
 0x160   : > { %v735_v18 = vadd.f32 %v734_v11, %v713_v13  ;;  %780 = vmatmul.bf16.vlgmr.msra.gmra.mxu1 %v1122_v14  ;;  %785 = vmatmul.bf16.vlgmr.msrb.gmra.mxu3 %v1123_v16 }
 0x162   : > { %736 = vst [vmem:[#allocation3] sm:$0x1] %v735_v18 }
 0x1dd   : > { %v781_v22 = vpop.f32.mrf.mxu1 }
 0x1de   : > { %v791_v23 = vadd.f32 %v781_v22, %v744_v21 }
 0x1e0   : > { %795 = vst [vmem:[#allocation4 + $0x10] sm:$0xff] %v791_v23 }
 0x1e3   : > { %v786_v17 = vpop.f32.mrf.mxu3 }
 0x1e4   : > { %v793_v25 = vadd.f32 %v786_v17, %v746_v15 }
 0x1e5   : > { %v783_v30 = vpop.f32.mrf.mxu1 }
 0x1e6   : > { %797 = vst [vmem:[#allocation4 + $0x18] sm:$0xff] %v793_v25  ;;  %v792_v31 = vadd.f32 %v783_v30, %v745_v27 }
 0x1e8   : > { %796 = vst [vmem:[#allocation4] sm:$0xff] %v792_v31 }
 0x1ea   : > { %803 = sbr.rel (%p1107_p9) target bundleno = 626 (0x272), region = 131 }
 0x1eb   : > { %v788_v34 = vpop.f32.mrf.mxu3 }
 0x1ec   : > { %v794_v35 = vadd.f32 %v788_v34, %v747_v33 }
 0x1ee   : > { %798 = vst [vmem:[#allocation4 + $0x8] sm:$0xff] %v794_v35 }
 0x1ef   : > { %v813_v36 = vld [vmem:[%s1602_s6 + $0x10] sm:$0xff]  ;;  %v811_v29 = vld [vmem:[%s1602_s6] sm:$0xff]  ;;  %v1411_v37 = vmov 0   ;;  %v814_v38 = vld [vmem:[%s1602_s6 + $0x18] sm:$0xff]  ;;  %v850_v46 = vstv %s806_s0 }
 0x1f0   : > { %1278 = vset.pattern.permute.xlu1 %v1411_v37  ;;  %1277 = vset.pattern.permute.xlu0 %v1411_v37  ;;  %v812_v39 = vld [vmem:[%s1602_s6 + $0x8] sm:$0xff]  ;;  %v804_v32 = vld [vmem:[#allocation3] sm:$0x1]  ;;  %v839_v41 = vld [vmem:[#allocation4 + $0x10] sm:$0xff] }
 0x1f1   : > { %827 = vperm.xlu1 %1278, %v813_v36   ;;  %817 = vperm.xlu0 %1277, %v811_v29   ;;  %1279 = vrcp.f32 %v804_v32  ;;  %v841_v43 = vld [vmem:[#allocation4 + $0x18] sm:$0xff]  ;;  %v809_v47 = vld [vmem:[%s1612_s21 + $0x10] sm:$0xff]  ;;  %v807_v48 = vld [vmem:[%s1612_s21] sm:$0xff] }
 0x1f2   : > { %v840_v54 = vld [vmem:[#allocation4] sm:$0xff]  ;;  %v810_v63 = vld [vmem:[%s1612_s21 + $0x18] sm:$0xff]  ;;  %v808_v0 = vld [vmem:[%s1612_s21 + $0x8] sm:$0xff] }
 0x1f5   : > { %v842_v53 = vld [vmem:[#allocation4 + $0x8] sm:$0xff] }
 0x1f7   : > { %v1280_v40 = vpop.eup %1279 }
 0x1f8   : > { %v844_v42 = vperm.slane %v1280_v40, 0 }
 0x1f9   : > { %832 = vperm.xlu1 %1278, %v814_v38   ;;  %822 = vperm.xlu0 %1277, %v812_v39  }
 0x1fa   : > { %v848_v44 = vmul.f32 %v844_v42, %v841_v43  ;;  %v846_v45 = vmul.f32 %v844_v42, %v839_v41  ;;  %v849_v61 = vmul.f32 %v844_v42, %v842_v53  ;;  %v847_v62 = vmul.f32 %v844_v42, %v840_v54 }
 0x1fc   : > { %v853_v49 = vmul.f32 %v850_v46, %v848_v44  ;;  %v851_v50 = vmul.f32 %v850_v46, %v846_v45  ;;  %v854_v1 = vmul.f32 %v850_v46, %v849_v61  ;;  %v852_v2 = vmul.f32 %v850_v46, %v847_v62 }
 0x263   : > { %v828_v51 = vpop.permute.xlu1 %827  ;;  %v818_v52 = vpop.permute.xlu0 %817 }
 0x264   : > { %v837_v55 = vmul.f32 %v828_v51, %v809_v47  ;;  %v835_v57 = vmul.f32 %v818_v52, %v807_v48 }
 0x266   : > { %v857_v59 = vadd.f32 %v853_v49, %v837_v55  ;;  %v855_v60 = vadd.f32 %v851_v50, %v835_v57 }
 0x268   : > { %861 = vst [vmem:[%s1615_s23 + $0x10] sm:$0xff] %v857_v59 }
 0x269   : > { %859 = vst [vmem:[%s1615_s23] sm:$0xff] %v855_v60 }
 0x26b   : > { %v833_v3 = vpop.permute.xlu1 %832  ;;  %v823_v4 = vpop.permute.xlu0 %822 }
 0x26c   : > { %v838_v5 = vmul.f32 %v833_v3, %v810_v63  ;;  %v836_v6 = vmul.f32 %v823_v4, %v808_v0 }
 0x26e   : > { %v858_v7 = vadd.f32 %v854_v1, %v838_v5  ;;  %v856_v8 = vadd.f32 %v852_v2, %v836_v6 }
 0x270   : > { %862 = vst [vmem:[%s1615_s23 + $0x18] sm:$0xff] %v858_v7 }
 0x271   : > { %860 = vst [vmem:[%s1615_s23 + $0x8] sm:$0xff] %v856_v8 }
 0x272 PF: > { %s1109_s4 = sshll.u32 %s1391_s30, 3  ;;  %s877_s28 = sshll.u32 %s1615_s23, 4  ;;  %s878_s28 = int_to_ptr.vmem [resolvable:$true] %s877_s28 }
 0x273   : > { %s874_s27 = sadd.s32 %s1387_s29, %s1109_s4  ;;  %s1787_s10 = sld [smem:[#allocation23_spill]] }
 0x274   : > { %s1110_s7 = sshll.u32 %s874_s27, 3  ;;  %s1788_s14 = sand.u32 1, %s1375_s26  }
 0x275   : > { %s864_s17 = scalar_lea.sflag [#allocation9], %s1788_s14 }
 0x279   : > { %s876_s19 = scalar_lea.hbm %s1787_s10, %s1110_s7  ;;  %s1301_s16 = scalar_lea.hbm %s1787_s10, 128 }
 0x27a   : > { %s879_s13 = sshll.u32 %s876_s19, 4  ;;  %s880_s13 = int_to_ptr.hbm [resolvable:$true] %s879_s13 }
 0x27b   : > { %s1295_s22 = sshra.s32 %s880_s13, 4  ;;  %s1296_s22 = int_to_ptr.hbm [resolvable:$true] %s1295_s22 }
 0x27c   : > { %s1297_s18 = scalar_lea.hbm %s1296_s22, 32  ;;  %p1302_p2 = scmp.lt.s32.totalorder %s1296_s22, %s1787_s10 }
 0x27d   : > { %p1298_p10 = scmp.ne.s32.totalorder %s1296_s22, %s1297_s18  ;;  %p1303_p1 = scmp.lt.s32.totalorder %s1301_s16, %s1297_s18 }
 0x27f   : > { %p1299_p13 = pnand %p1298_p10, %p1552_p11  ;;  %p1304_p3 = por %p1303_p1, %p1302_p2 }
 0x281   : > { %p1300_p0 = pneg %p1299_p13 }
 0x283   : > { %p1305_p4 = pnand %p1304_p3, %p1300_p0 }
 0x285   : > { %1308 = shalt.err (!%p1305_p4)
}
 0x286   : > { %s1412_s15 = smov 128   ;;  %s1413_s21 = smov 256  }
 0x287   : > { %s1414_s12 = smov 8  }
 0x288   : > { %1134 = dma.vmem_to_hbm [thread:$0]  (%p1552_p11), %s878_s28, 512, %s880_s13, %s864_s17, %s1412_s15, %s1413_s21, %s1414_s12  }
 0x289 PF: > { %s1789_s23 = sld [smem:[#allocation11_spill]]  ;;  %p1140_p5 = scmp.ge.s32.totalorder %s1407_s9, 2 }
 0x28b   : > { %p1137_p6 = pnand %p1140_p5, %p1556_p12 }
 0x28d   : > { %p1138_p7 = pneg %p1137_p6 }
 0x28f   : > { %s894_s4 = sand.u32 1, %s1789_s23  }
 0x290   : > { %s895_s27 = scalar_lea.sflag [#allocation9], %s894_s4 }
 0x291   : > { %1358 = dma.done.wait (%p1138_p7), %s895_s27, 512  }
 0x292   : > { %1360 = vsyncadd (%p1138_p7), %s895_s27, 4294966784  ;;  %s20_s9 = sadd.s32 1, %s1407_s9   ;;  %s1791_s20 = sld [smem:[#allocation12_spill]] }
 0x293   : > { %p17_p8 = scmp.ge.s32.totalorder %s20_s9, 10   ;;  %s1792_s27 = sld [smem:[#allocation20_spill]] }
 0x294   : > { %s1793_s28 = sld [smem:[#allocation13_spill]]  ;;  %s1799_s23 = smov %s1375_s26 }
 0x295   : > { %s1794_s29 = sld [smem:[#allocation14_spill]]  ;;  %s1800_s24 = smov %s1371_s25 }
 0x296   : > { %s1795_s30 = sld [smem:[#allocation15_spill]]  ;;  %s1801_s25 = smov %s1567_s11 }
 0x297   : > { %s1796_s7 = sld [smem:[#allocation16_spill]]  ;;  %19 = sbr.rel (!%p17_p8) target bundleno = 12 (0xc), region = 188 }
 0x298   : > { %s1797_s5 = sld [smem:[#allocation17_spill]]  ;;  %s1802_s26 = smov %s1791_s20 }
 0x299   : > { %s1798_s8 = sld [smem:[#allocation18_spill]] }
 0x29c   :  { %901 = vsyncpa [#allocation9], 1 }
 0x29d   :  { %903 = vsyncpa [#allocation9 + $0x1], 1 }

</bundles_post_ra>
